<compile_context>
chip_gen: v7x
topology: tpu7x:2x2x1
jax: 0.10.0
libtpu: 0.0.40
codegen_flags: <defaults>
</compile_context>

<pallas_src>
import math

import jax
import jax.numpy as jnp
from jax.experimental import pallas as pl
from jax.experimental.pallas import tpu as pltpu

# Row-tile height.  128 is safe on every generation (v5e: single vst slot,
# no-bf16 VPU).  TODO(synk): bump to 256 on v6e/v7x for fuller MXU row fill.
_TM = 128
_LANE = 128


def _round_up(x, m):
    return ((x + m - 1) // m) * m


# ----------------------------------------------------------------------------
# Fused per-row MLP kernel:
#   pixunproj_processor (Linear+BN+ReLU) -> hyp_generator (3 layers).
# Grid is over tiles of the flattened (B*nH) row axis.
#   up_ref : (TM, F)   bf16      sc_ref : (TM, H1) f32 (q/Sv contribution + b1)
#   o_ref  : (TM, DP)  f32  (DP = dim_xi_T rounded up to 128, lane-dense store)
# ----------------------------------------------------------------------------
def _texture_mlp_kernel(up_ref, sc_ref,
                        wp1_ref, bp1_ref,          # pixunproj_processor
                        wh1p_ref,                  # hyp_generator L1 (pix part)
                        wh2_ref, bh2_ref,          # hyp_generator L2
                        wh3_ref, bh3_ref,          # hyp_generator L3 (plain Linear)
                        o_ref):
    f32 = jnp.float32
    bf16 = jnp.bfloat16

    # pix = relu(up @ Wp1 + bp1)                               (TM, 512)
    pix = jnp.dot(up_ref[...], wp1_ref[...], preferred_element_type=f32)
    pix = jnp.maximum(pix + bp1_ref[...], 0.0)

    # hyp layer 1: Y = [pix, q, Sv] is never built; the q/Sv contribution and
    # the layer-1 bias are pre-summed per row into sc_ref.
    h1 = jnp.dot(pix.astype(bf16), wh1p_ref[...], preferred_element_type=f32)
    h1 = jnp.maximum(h1 + sc_ref[...], 0.0)                    # (TM, H1)

    h2 = jnp.dot(h1.astype(bf16), wh2_ref[...], preferred_element_type=f32)
    h2 = jnp.maximum(h2 + bh2_ref[...], 0.0)                   # (TM, H2)

    out = jnp.dot(h2.astype(bf16), wh3_ref[...], preferred_element_type=f32)
    o_ref[...] = (out + bh3_ref[...]).astype(o_ref.dtype)      # (TM, DP)


def texture_mlp(up, sc, p):
    """up: (M_pad, F) bf16, sc: (M_pad, H1) f32 -> (M_pad, DP) f32."""
    M_pad, F = up.shape
    H1 = p["wh1_pix"].shape[1]
    H2 = p["wh2"].shape[1]
    DP = p["wh3"].shape[1]
    assert M_pad % _TM == 0

    weight_args = [p["wp1"], p["bp1"], p["wh1_pix"],
                   p["wh2"], p["bh2"], p["wh3"], p["bh3"]]
    # Constant-index full-array blocks: DMA'd once, resident across the grid.
    # TODO(synk): mark these pipeline_mode=pl.Buffered(1) once single-buffered
    # constant blocks are supported to reclaim the (tiny) double-buffer VMEM.
    weight_specs = [pl.BlockSpec(w.shape, lambda i: (0, 0)) for w in weight_args]

    flops = 2 * M_pad * (F * 512 + 512 * H1 + H1 * H2 + H2 * DP)
    w_bytes = sum(int(w.size) * w.dtype.itemsize for w in weight_args)
    bytes_accessed = (M_pad * F * 2          # up (bf16)
                      + M_pad * H1 * 4       # sc (f32)
                      + M_pad * DP * 4       # output (f32)
                      + w_bytes)

    return pl.pallas_call(
        _texture_mlp_kernel,
        out_shape=jax.ShapeDtypeStruct((M_pad, DP), jnp.float32),
        grid=(M_pad // _TM,),
        in_specs=[
            pl.BlockSpec((_TM, F), lambda i: (i, 0)),
            pl.BlockSpec((_TM, H1), lambda i: (i, 0)),
        ] + weight_specs,
        out_specs=pl.BlockSpec((_TM, DP), lambda i: (i, 0)),
        compiler_params=pltpu.CompilerParams(
            dimension_semantics=("parallel",),       # tiles split across TCs (v7x)
            vmem_limit_bytes=16 * 1024 * 1024,       # actual footprint << 2 MiB
        ),
        cost_estimate=pl.CostEstimate(
            flops=flops, transcendentals=0, bytes_accessed=bytes_accessed),
    )(up, sc, *weight_args)


# ----------------------------------------------------------------------------
# LBA_stack_to_reshape equivalent: (W, scale, bias, relu) layers with eval-mode
# BatchNorm folded into per-column (scale, shift).
# ----------------------------------------------------------------------------
def make_lba_stack(key, dims, end_with_lin):
    params = []
    n = len(dims) - 1
    for i in range(n):
        key, k1, k2, k3, k4, k5, k6 = jax.random.split(key, 7)
        fan_in, fan_out = dims[i], dims[i + 1]
        bound = 1.0 / math.sqrt(fan_in)
        W = jax.random.uniform(k1, (fan_in, fan_out), jnp.float32, -bound, bound)
        b = jax.random.uniform(k2, (fan_out,), jnp.float32, -bound, bound)
        is_last = i == n - 1
        if is_last and end_with_lin:
            scale = jnp.ones((fan_out,), jnp.float32)
            shift = b
            relu = False
        else:
            gamma = 1.0 + 0.1 * jax.random.normal(k3, (fan_out,), jnp.float32)
            beta = 0.1 * jax.random.normal(k4, (fan_out,), jnp.float32)
            rmean = 0.1 * jax.random.normal(k5, (fan_out,), jnp.float32)
            rvar = 1.0 + 0.1 * jnp.abs(jax.random.normal(k6, (fan_out,), jnp.float32))
            s = gamma / jnp.sqrt(rvar + 1e-5)
            scale = s
            shift = (b - rmean) * s + beta
            relu = True
        params.append((W, scale.reshape(1, -1), shift.reshape(1, -1), relu))
    return params


def fold_layer(layer):
    """Fold BN scale into the weight matrix; return (W_folded, shift) in f32."""
    W, scale, shift, _ = layer
    return W * scale, shift


def init_params(key, q_dim, v_dim, nV, dim_xi_T, n_input_channels):
    proc_shape_dim = 32
    intermed = 512
    tot_D = intermed + q_dim + proc_shape_dim     # use_M_E=False, shortcut_dim=0
    k1, k2, k3 = jax.random.split(key, 3)
    v_stack = make_lba_stack(k1, [v_dim, 128, proc_shape_dim], end_with_lin=False)
    p_stack = make_lba_stack(k2, [n_input_channels * nV, intermed], end_with_lin=False)
    h_stack = make_lba_stack(
        k3, [tot_D, dim_xi_T * 3, dim_xi_T * 2, dim_xi_T], end_with_lin=True)

    bf16, f32 = jnp.bfloat16, jnp.float32

    wv1, bv1 = fold_layer(v_stack[0])
    wv2, bv2 = fold_layer(v_stack[1])
    wp1, bp1 = fold_layer(p_stack[0])
    wh1, bh1 = fold_layer(h_stack[0])
    wh2, bh2 = fold_layer(h_stack[1])
    wh3, bh3 = fold_layer(h_stack[2])

    # Pad hyp_generator widths to lane multiples (zero columns/rows) so the
    # in-kernel matmuls and the output store are lane-dense.
    H1 = _round_up(dim_xi_T * 3, _LANE)
    H2 = _round_up(dim_xi_T * 2, _LANE)
    DP = _round_up(dim_xi_T, _LANE)

    def pad_to(a, shape):
        return jnp.pad(a, [(0, t - s) for s, t in zip(a.shape, shape)])

    wh1 = pad_to(wh1, (tot_D, H1)); bh1 = pad_to(bh1, (1, H1))
    wh2 = pad_to(wh2, (H1, H2));    bh2 = pad_to(bh2, (1, H2))
    wh3 = pad_to(wh3, (H2, DP));    bh3 = pad_to(bh3, (1, DP))

    # Split hyp layer 1 along input rows: Y = [pix(512), q, Sv(32)] never built.
    wh1_pix = wh1[:intermed]
    wh1_q = wh1[intermed:intermed + q_dim]
    wh1_sv = wh1[intermed + q_dim:]

    return {
        # hoisted (per-batch-element, plain XLA) pieces
        "wv1": wv1.astype(bf16), "bv1": bv1.astype(f32),
        "wv2": wv2.astype(bf16), "bv2": bv2.astype(f32),
        "wh1_q": wh1_q.astype(bf16), "wh1_sv": wh1_sv.astype(bf16),
        "bh1": bh1.astype(f32),
        # per-row fused MLP (Pallas kernel)
        "wp1": wp1.astype(bf16), "bp1": bp1.astype(f32),
        "wh1_pix": wh1_pix.astype(bf16),
        "wh2": wh2.astype(bf16), "bh2": bh2.astype(f32),
        "wh3": wh3.astype(bf16), "bh3": bh3.astype(f32),
    }


# ----------------------------------------------------------------------------
# pixunproj (glue): per-vertex pixel sampling from the image, per batch element
# (the image is never broadcast nH-fold).
# TODO(synk): the real graphicsutils.pixel_unproject uses the renderer's camera
# model; here vertices' (x, y) in [-1, 1] are mapped to pixel coords and sampled
# with nearest-neighbor (data-dependent gather, done in plain JAX).  Fusing the
# gather into the kernel (scalar-prefetched indices + image VMEM block) would
# remove the remaining HBM round-trip of the (B*nH, nV*C) tensor.
# ----------------------------------------------------------------------------
def pixel_unproject_nn(M_E, I):
    """M_E: (B, nH, nV, 3), I: (B, C, H, W) -> (B, nH, nV*C)."""
    B, C, H, W = I.shape
    nH, nV = M_E.shape[1], M_E.shape[2]
    u = jnp.clip(jnp.round((M_E[..., 0] + 1.0) * 0.5 * (W - 1)), 0, W - 1).astype(jnp.int32)
    vv = jnp.clip(jnp.round((M_E[..., 1] + 1.0) * 0.5 * (H - 1)), 0, H - 1).astype(jnp.int32)

    def sample_one(img, uu, vvv):          # img: (C, H, W), uu/vvv: (nH, nV)
        return img[:, vvv, uu]             # (C, nH, nV)

    g = jax.vmap(sample_one)(I, u, vv)     # (B, C, nH, nV)
    g = jnp.transpose(g, (0, 2, 3, 1))     # (B, nH, nV, C)  (vertex-major, like torch)
    return g.reshape(B, nH, nV * C)


# ----------------------------------------------------------------------------
# Full module forward
# ----------------------------------------------------------------------------
def forward(params, I, q, v, M_E, *, dim_xi_T):
    """I: (B,C,H,W), q: (B,q_dim), v: (B,v_dim), M_E: (B,nH,nV,3) -> (B,nH,dim_xi_T)."""
    B, nH, nV, _ = M_E.shape
    BI, C, H, W = I.shape
    assert B == BI
    bf16, f32 = jnp.bfloat16, jnp.float32
    # detach_M_E / detach_v / no-backprop-through-unprojection are no-ops here.

    unprojs = pixel_unproject_nn(M_E, I)                         # (B, nH, nV*C) f32
    Mrows = B * nH
    F = unprojs.shape[-1]
    up = unprojs.reshape(Mrows, F).astype(bf16)                  # bf16 in wrapper

    # v_preproc + (q, Sv) contribution to hyp layer 1: once per batch element,
    # hoisted out of the kernel (tiny matmuls, plain XLA).
    h = jnp.dot(v.astype(bf16), params["wv1"], preferred_element_type=f32) + params["bv1"]
    h = jnp.maximum(h, 0.0)
    sv = jnp.dot(h.astype(bf16), params["wv2"], preferred_element_type=f32) + params["bv2"]
    sv = jnp.maximum(sv, 0.0)                                    # (B, 32)
    sc = (jnp.dot(q.astype(bf16), params["wh1_q"], preferred_element_type=f32)
          + jnp.dot(sv.astype(bf16), params["wh1_sv"], preferred_element_type=f32)
          + params["bh1"])                                       # (B, H1)
    H1 = sc.shape[-1]
    sc = jnp.broadcast_to(sc[:, None, :], (B, nH, H1)).reshape(Mrows, H1)

    # Pad the flattened row axis to a multiple of the tile height.
    M_pad = max(_TM, _round_up(Mrows, _TM))
    if M_pad != Mrows:
        up = jnp.pad(up, ((0, M_pad - Mrows), (0, 0)))
        sc = jnp.pad(sc, ((0, M_pad - Mrows), (0, 0)))

    out = texture_mlp(up, sc, params)                            # (M_pad, DP) f32
    return out[:Mrows, :dim_xi_T].reshape(B, nH, dim_xi_T)


def forward_ref(params, I, q, v, M_E, *, dim_xi_T):
    """Pure-jnp reference using the same folded/padded bf16 weights."""
    B, nH = M_E.shape[0], M_E.shape[1]
    bf16, f32 = jnp.bfloat16, jnp.float32
    up = pixel_unproject_nn(M_E, I).reshape(B * nH, -1).astype(bf16)
    h = jnp.maximum(jnp.dot(v.astype(bf16), params["wv1"], preferred_element_type=f32)
                    + params["bv1"], 0.0)
    sv = jnp.maximum(jnp.dot(h.astype(bf16), params["wv2"], preferred_element_type=f32)
                     + params["bv2"], 0.0)
    sc = (jnp.dot(q.astype(bf16), params["wh1_q"], preferred_element_type=f32)
          + jnp.dot(sv.astype(bf16), params["wh1_sv"], preferred_element_type=f32)
          + params["bh1"])
    sc = jnp.broadcast_to(sc[:, None, :], (B, nH, sc.shape[-1])).reshape(B * nH, -1)
    pix = jnp.maximum(jnp.dot(up, params["wp1"], preferred_element_type=f32)
                      + params["bp1"], 0.0)
    h1 = jnp.maximum(jnp.dot(pix.astype(bf16), params["wh1_pix"],
                             preferred_element_type=f32) + sc, 0.0)
    h2 = jnp.maximum(jnp.dot(h1.astype(bf16), params["wh2"],
                             preferred_element_type=f32) + params["bh2"], 0.0)
    out = jnp.dot(h2.astype(bf16), params["wh3"],
                  preferred_element_type=f32) + params["bh3"]
    return out[:, :dim_xi_T].reshape(B, nH, dim_xi_T)


if __name__ == "__main__":
    # small shapes consistent with the module
    B, nH, nV = 2, 2, 16
    C, H, W = 4, 16, 16          # use_occlusion = False -> C == n_input_channels == 4
    q_dim, v_dim, dim_xi_T = 8, 16, 32

    key = jax.random.PRNGKey(0)
    kp, kI, kq, kv, kM = jax.random.split(key, 5)

    params = init_params(kp, q_dim, v_dim, nV, dim_xi_T, C)
    I = jax.random.uniform(kI, (B, C, H, W), jnp.float32)
    q = jax.random.normal(kq, (B, q_dim), jnp.float32)
    v = jax.random.normal(kv, (B, v_dim), jnp.float32)
    M_E = jax.random.uniform(kM, (B, nH, nV, 3), jnp.float32, minval=-1.0, maxval=1.0)

    fwd = jax.jit(forward, static_argnames=("dim_xi_T",))
    out = jax.block_until_ready(fwd(params, I, q, v, M_E, dim_xi_T=dim_xi_T))
    assert out.shape == (B, nH, dim_xi_T)
    assert bool(jnp.all(jnp.isfinite(out)))

    ref = forward_ref(params, I, q, v, M_E, dim_xi_T=dim_xi_T)
    max_err = float(jnp.max(jnp.abs(out - ref)))
    assert bool(jnp.allclose(out, ref, rtol=3e-2, atol=3e-2)), max_err
    print("KERNEL_OK")
</pallas_src>

<mosaic_0001>
module attributes {stable_mosaic.version = 11 : i64} {
  func.func @_texture_mlp_kernel(%arg0: i32, %arg1: memref<128x64xbf16, #tpu.memory_space<vmem>>, %arg2: memref<128x128xf32, #tpu.memory_space<vmem>>, %arg3: memref<64x512xbf16, #tpu.memory_space<vmem>>, %arg4: memref<1x512xf32, #tpu.memory_space<vmem>>, %arg5: memref<512x128xbf16, #tpu.memory_space<vmem>>, %arg6: memref<128x128xbf16, #tpu.memory_space<vmem>>, %arg7: memref<1x128xf32, #tpu.memory_space<vmem>>, %arg8: memref<128x128xbf16, #tpu.memory_space<vmem>>, %arg9: memref<1x128xf32, #tpu.memory_space<vmem>>, %arg10: memref<128x128xf32, #tpu.memory_space<vmem>>) attributes {dimension_semantics = [#tpu.dimension_semantics<parallel>], iteration_bounds = array<i64: 1>, scalar_prefetch = 0 : i64, scratch_operands = 0 : i64, tpu.core_type = #tpu.core_type<tc>, window_params = [{transform_indices = @transform_0, window_bounds = array<i64: 128, 64>}, {transform_indices = @transform_1, window_bounds = array<i64: 128, 128>}, {pipeline_mode = #tpu.pipeline_mode<synchronous>, transform_indices = @transform_2, window_bounds = array<i64: 64, 512>}, {pipeline_mode = #tpu.pipeline_mode<synchronous>, transform_indices = @transform_3, window_bounds = array<i64: 1, 512>}, {pipeline_mode = #tpu.pipeline_mode<synchronous>, transform_indices = @transform_4, window_bounds = array<i64: 512, 128>}, {pipeline_mode = #tpu.pipeline_mode<synchronous>, transform_indices = @transform_5, window_bounds = array<i64: 128, 128>}, {pipeline_mode = #tpu.pipeline_mode<synchronous>, transform_indices = @transform_6, window_bounds = array<i64: 1, 128>}, {pipeline_mode = #tpu.pipeline_mode<synchronous>, transform_indices = @transform_7, window_bounds = array<i64: 128, 128>}, {pipeline_mode = #tpu.pipeline_mode<synchronous>, transform_indices = @transform_8, window_bounds = array<i64: 1, 128>}, {transform_indices = @transform_9, window_bounds = array<i64: 128, 128>}]} {
    %c0 = arith.constant 0 : index
    %c0_0 = arith.constant 0 : index
    %0 = vector.load %arg1[%c0, %c0_0] : memref<128x64xbf16, #tpu.memory_space<vmem>>, vector<128x64xbf16>
    %c0_1 = arith.constant 0 : index
    %c0_2 = arith.constant 0 : index
    %1 = vector.load %arg3[%c0_1, %c0_2] : memref<64x512xbf16, #tpu.memory_space<vmem>>, vector<64x512xbf16>
    %cst = arith.constant dense<0.000000e+00> : vector<128x512xf32>
    %2 = tpu.matmul %0, %1, %cst {dimension_numbers = #tpu.dot_dimension_numbers<[1], [0], [0], [1], [0, 0, 1, 1], [], []>} : vector<128x64xbf16>, vector<64x512xbf16>, vector<128x512xf32> -> vector<128x512xf32>
    %c0_3 = arith.constant 0 : index
    %c0_4 = arith.constant 0 : index
    %3 = vector.load %arg4[%c0_3, %c0_4] : memref<1x512xf32, #tpu.memory_space<vmem>>, vector<1x512xf32>
    %4 = vector.broadcast %3 : vector<1x512xf32> to vector<128x512xf32>
    %5 = arith.addf %2, %4 : vector<128x512xf32>
    %cst_5 = arith.constant 0.000000e+00 : f32
    %6 = vector.broadcast %cst_5 : f32 to vector<128x512xf32>
    %7 = arith.maximumf %5, %6 : vector<128x512xf32>
    %8 = arith.truncf %7 : vector<128x512xf32> to vector<128x512xbf16>
    %c0_6 = arith.constant 0 : index
    %c0_7 = arith.constant 0 : index
    %9 = vector.load %arg5[%c0_6, %c0_7] : memref<512x128xbf16, #tpu.memory_space<vmem>>, vector<512x128xbf16>
    %cst_8 = arith.constant dense<0.000000e+00> : vector<128x128xf32>
    %10 = tpu.matmul %8, %9, %cst_8 {dimension_numbers = #tpu.dot_dimension_numbers<[1], [0], [0], [1], [0, 0, 1, 1], [], []>} : vector<128x512xbf16>, vector<512x128xbf16>, vector<128x128xf32> -> vector<128x128xf32>
    %c0_9 = arith.constant 0 : index
    %c0_10 = arith.constant 0 : index
    %11 = vector.load %arg2[%c0_9, %c0_10] : memref<128x128xf32, #tpu.memory_space<vmem>>, vector<128x128xf32>
    %12 = arith.addf %10, %11 : vector<128x128xf32>
    %cst_11 = arith.constant 0.000000e+00 : f32
    %13 = vector.broadcast %cst_11 : f32 to vector<128x128xf32>
    %14 = arith.maximumf %12, %13 : vector<128x128xf32>
    %15 = arith.truncf %14 : vector<128x128xf32> to vector<128x128xbf16>
    %c0_12 = arith.constant 0 : index
    %c0_13 = arith.constant 0 : index
    %16 = vector.load %arg6[%c0_12, %c0_13] : memref<128x128xbf16, #tpu.memory_space<vmem>>, vector<128x128xbf16>
    %cst_14 = arith.constant dense<0.000000e+00> : vector<128x128xf32>
    %17 = tpu.matmul %15, %16, %cst_14 {dimension_numbers = #tpu.dot_dimension_numbers<[1], [0], [0], [1], [0, 0, 1, 1], [], []>} : vector<128x128xbf16>, vector<128x128xbf16>, vector<128x128xf32> -> vector<128x128xf32>
    %c0_15 = arith.constant 0 : index
    %c0_16 = arith.constant 0 : index
    %18 = vector.load %arg7[%c0_15, %c0_16] : memref<1x128xf32, #tpu.memory_space<vmem>>, vector<1x128xf32>
    %19 = vector.broadcast %18 : vector<1x128xf32> to vector<128x128xf32>
    %20 = arith.addf %17, %19 : vector<128x128xf32>
    %cst_17 = arith.constant 0.000000e+00 : f32
    %21 = vector.broadcast %cst_17 : f32 to vector<128x128xf32>
    %22 = arith.maximumf %20, %21 : vector<128x128xf32>
    %23 = arith.truncf %22 : vector<128x128xf32> to vector<128x128xbf16>
    %c0_18 = arith.constant 0 : index
    %c0_19 = arith.constant 0 : index
    %24 = vector.load %arg8[%c0_18, %c0_19] : memref<128x128xbf16, #tpu.memory_space<vmem>>, vector<128x128xbf16>
    %cst_20 = arith.constant dense<0.000000e+00> : vector<128x128xf32>
    %25 = tpu.matmul %23, %24, %cst_20 {dimension_numbers = #tpu.dot_dimension_numbers<[1], [0], [0], [1], [0, 0, 1, 1], [], []>} : vector<128x128xbf16>, vector<128x128xbf16>, vector<128x128xf32> -> vector<128x128xf32>
    %c0_21 = arith.constant 0 : index
    %c0_22 = arith.constant 0 : index
    %26 = vector.load %arg9[%c0_21, %c0_22] : memref<1x128xf32, #tpu.memory_space<vmem>>, vector<1x128xf32>
    %27 = vector.broadcast %26 : vector<1x128xf32> to vector<128x128xf32>
    %28 = arith.addf %25, %27 : vector<128x128xf32>
    %c0_23 = arith.constant 0 : index
    %c0_24 = arith.constant 0 : index
    %29 = vector.load %arg10[%c0_23, %c0_24] : memref<128x128xf32, #tpu.memory_space<vmem>>, vector<128x128xf32>
    tpu.vector_store %arg10[%c0_23, %c0_24], %28 {strides = array<i32>} : memref<128x128xf32, #tpu.memory_space<vmem>>, vector<128x128xf32>,
    return
  }
  func.func @transform_0(%arg0: i32) -> (i32, i32) {
    %c0_i32 = arith.constant 0 : i32
    %c0_i32_0 = arith.constant 0 : i32
    return %arg0, %c0_i32 : i32, i32
  }
  func.func @transform_1(%arg0: i32) -> (i32, i32) {
    %c0_i32 = arith.constant 0 : i32
    %c0_i32_0 = arith.constant 0 : i32
    return %arg0, %c0_i32 : i32, i32
  }
  func.func @transform_2(%arg0: i32) -> (i32, i32) {
    %c0_i32 = arith.constant 0 : i32
    %c0_i32_0 = arith.constant 0 : i32
    %c0_i32_1 = arith.constant 0 : i32
    return %c0_i32, %c0_i32_0 : i32, i32
  }
  func.func @transform_3(%arg0: i32) -> (i32, i32) {
    %c0_i32 = arith.constant 0 : i32
    %c0_i32_0 = arith.constant 0 : i32
    %c0_i32_1 = arith.constant 0 : i32
    return %c0_i32, %c0_i32_0 : i32, i32
  }
  func.func @transform_4(%arg0: i32) -> (i32, i32) {
    %c0_i32 = arith.constant 0 : i32
    %c0_i32_0 = arith.constant 0 : i32
    %c0_i32_1 = arith.constant 0 : i32
    return %c0_i32, %c0_i32_0 : i32, i32
  }
  func.func @transform_5(%arg0: i32) -> (i32, i32) {
    %c0_i32 = arith.constant 0 : i32
    %c0_i32_0 = arith.constant 0 : i32
    %c0_i32_1 = arith.constant 0 : i32
    return %c0_i32, %c0_i32_0 : i32, i32
  }
  func.func @transform_6(%arg0: i32) -> (i32, i32) {
    %c0_i32 = arith.constant 0 : i32
    %c0_i32_0 = arith.constant 0 : i32
    %c0_i32_1 = arith.constant 0 : i32
    return %c0_i32, %c0_i32_0 : i32, i32
  }
  func.func @transform_7(%arg0: i32) -> (i32, i32) {
    %c0_i32 = arith.constant 0 : i32
    %c0_i32_0 = arith.constant 0 : i32
    %c0_i32_1 = arith.constant 0 : i32
    return %c0_i32, %c0_i32_0 : i32, i32
  }
  func.func @transform_8(%arg0: i32) -> (i32, i32) {
    %c0_i32 = arith.constant 0 : i32
    %c0_i32_0 = arith.constant 0 : i32
    %c0_i32_1 = arith.constant 0 : i32
    return %c0_i32, %c0_i32_0 : i32, i32
  }
  func.func @transform_9(%arg0: i32) -> (i32, i32) {
    %c0_i32 = arith.constant 0 : i32
    %c0_i32_0 = arith.constant 0 : i32
    return %arg0, %c0_i32 : i32, i32
  }
}

</mosaic_0001>

<bundles_post_ra>
// kernel: forward.1
= control target key start
LH: loop header
LB: loop body
LE: loop exit
PB: predicated region body
PF: predicated region fallthrough
CT: control target
= control target key end

     0   :  { %v1819_v1 = vmov 0   ;;  %vm207_vm0 = vcmask 523264   ;;  %v67_v58 = vlaneseq  ;;  %s2299_s2 = inlined_call_operand.vmem [shape: bf16[64,512], index: 2, kind: input, shape index: {}]   ;;  %s2300_s0 = inlined_call_operand.vmem [shape: bf16[128,64], index: 0, kind: input, shape index: {}]   ;;  %s2301_s4 = inlined_call_operand.vmem [shape: bf16[512,128], index: 4, kind: input, shape index: {}]   ;;  %s2302_s5 = inlined_call_operand.vmem [shape: bf16[128,128], index: 5, kind: input, shape index: {}]   ;;  %s2303_s3 = inlined_call_operand.vmem [shape: f32[1,512], index: 3, kind: input, shape index: {}]   ;;  %s2304_s7 = inlined_call_operand.vmem [shape: bf16[128,128], index: 7, kind: input, shape index: {}]   ;;  %s2305_s1 = inlined_call_operand.vmem [shape: f32[128,128], index: 1, kind: input, shape index: {}]   ;;  %s2306_s6 = inlined_call_operand.vmem [shape: f32[1,128], index: 6, kind: input, shape index: {}]   ;;  %s2307_s8 = inlined_call_operand.vmem [shape: f32[1,128], index: 8, kind: input, shape index: {}]   ;;  %s2308_s9 = inlined_call_operand.vmem [shape: f32[128,128], index: 9, kind: output, shape index: {}]  }
   0x1   :  { %v1739_v0 = vld [vmem:[%s2299_s2 + $0x4] ss:$16 sps:$4 sm:$0xff]   ;;  %264 = vmatprep.mubr.bf16.mxu0 %v1819_v1  ;;  %377 = vmatprep.mubr.bf16.mxu1 %v1819_v1  ;;  %v1741_v2 = vld [vmem:[%s2299_s2 + $0xc] ss:$16 sps:$4 sm:$0xff]   ;;  %v1743_v3 = vld [vmem:[%s2299_s2] ss:$16 sps:$4 sm:$0xff]  }
   0x2   :  { %232 = vmatprep.subr.bf16.mxu0 %v1739_v0  ;;  %v1744_v4 = vld [vmem:[%s2299_s2 + $0x8] ss:$16 sps:$4 sm:$0xff]   ;;  %345 = vmatprep.subr.bf16.mxu1 %v1741_v2  ;;  %v1745_v5 = vld [vmem:[%s2299_s2 + $0x24] ss:$16 sps:$4 sm:$0xff]   ;;  %v1747_v6 = vld [vmem:[%s2299_s2 + $0x2c] ss:$16 sps:$4 sm:$0xff]  }
   0x3   :  { %233 = vmatpush1.bf16.msra.mxu0 %v1743_v3  ;;  %346 = vmatpush1.bf16.msra.mxu1 %v1744_v4  ;;  %v1749_v7 = vld [vmem:[%s2299_s2 + $0x20] ss:$16 sps:$4 sm:$0xff]   ;;  %v1750_v8 = vld [vmem:[%s2299_s2 + $0x28] ss:$16 sps:$4 sm:$0xff]   ;;  %v1751_v9 = vld [vmem:[%s2299_s2 + $0x44] ss:$16 sps:$4 sm:$0xff]  }
   0x4   :  { %234 = vmatprep.subr.bf16.mxu0 %v1745_v5  ;;  %347 = vmatprep.subr.bf16.mxu1 %v1747_v6  ;;  %v1753_v10 = vld [vmem:[%s2299_s2 + $0x4c] ss:$16 sps:$4 sm:$0xff]   ;;  %v1755_v11 = vld [vmem:[%s2299_s2 + $0x40] ss:$16 sps:$4 sm:$0xff]   ;;  %v1756_v12 = vld [vmem:[%s2299_s2 + $0x48] ss:$16 sps:$4 sm:$0xff]  }
   0x5   :  { %v1757_v13 = vld [vmem:[%s2299_s2 + $0x64] ss:$16 sps:$4 sm:$0xff]   ;;  %v1759_v14 = vld [vmem:[%s2299_s2 + $0x6c] ss:$16 sps:$4 sm:$0xff]   ;;  %v1761_v15 = vld [vmem:[%s2299_s2 + $0x60] ss:$16 sps:$4 sm:$0xff]  }
   0x6   :  { %v1762_v16 = vld [vmem:[%s2299_s2 + $0x68] ss:$16 sps:$4 sm:$0xff]   ;;  %v1763_v17 = vld [vmem:[%s2300_s0] sm:$0xff]   ;;  %v1779_v27 = vld [vmem:[%s2301_s4 + $0x50] sm:$0xff]   ;;  %v68_v59 = vshrl.u32 %v67_v58, 7 }
   0x7   :  { %235 = vmatpush1.bf16.msra.mxu0 %v1749_v7  ;;  %348 = vmatpush1.bf16.msra.mxu1 %v1750_v8  ;;  %v1771_v18 = vld [vmem:[%s2301_s4 + $0x40] sm:$0xff]   ;;  %v1764_v20 = vld [vmem:[%s2300_s0 + $0x8] sm:$0xff]   ;;  %v1780_v28 = vld [vmem:[%s2301_s4 + $0x10] sm:$0xff]  }
   0x8   :  { %236 = vmatprep.subr.bf16.mxu0 %v1751_v9  ;;  %349 = vmatprep.subr.bf16.mxu1 %v1753_v10  ;;  %v1772_v19 = vld [vmem:[%s2301_s4] sm:$0xff]   ;;  %v1775_v23 = vld [vmem:[%s2301_s4 + $0x48] sm:$0xff]   ;;  %v1765_v29 = vld [vmem:[%s2300_s0 + $0x10] sm:$0xff]   ;;  %v69_v60 = vsub.s32 0, %v68_v59  ;;  %v77_v61 = vsub.s32 2, %v68_v59  ;;  %v73_v63 = vsub.s32 1, %v68_v59 }
   0x9   :  { %v1773_v21 = vld [vmem:[%s2301_s4 + $0xc0] sm:$0xff]   ;;  %v1776_v24 = vld [vmem:[%s2301_s4 + $0x8] sm:$0xff]   ;;  %v1781_v30 = vld [vmem:[%s2301_s4 + $0xd0] sm:$0xff]   ;;  %v81_v0 = vsub.s32 3, %v68_v59 }
   0xa   :  { %v1774_v22 = vld [vmem:[%s2301_s4 + $0x80] sm:$0xff]   ;;  %v1777_v25 = vld [vmem:[%s2301_s4 + $0xc8] sm:$0xff]   ;;  %v1782_v31 = vld [vmem:[%s2301_s4 + $0x90] sm:$0xff]  }
   0xb   :  { %237 = vmatpush1.bf16.msra.mxu0 %v1755_v11  ;;  %350 = vmatpush1.bf16.msra.mxu1 %v1756_v12  ;;  %v1778_v26 = vld [vmem:[%s2301_s4 + $0x88] sm:$0xff]   ;;  %v1783_v32 = vld [vmem:[%s2301_s4 + $0x58] sm:$0xff]   ;;  %v1787_v36 = vld [vmem:[%s2301_s4 + $0x60] sm:$0xff]  }
   0xc   :  { %238 = vmatprep.subr.bf16.mxu0 %v1757_v13  ;;  %351 = vmatprep.subr.bf16.mxu1 %v1759_v14  ;;  %v1784_v33 = vld [vmem:[%s2301_s4 + $0x18] sm:$0xff]   ;;  %v1788_v37 = vld [vmem:[%s2301_s4 + $0x20] sm:$0xff]   ;;  %v1791_v41 = vld [vmem:[%s2301_s4 + $0x68] sm:$0xff]  }
   0xd   :  { %v1785_v34 = vld [vmem:[%s2301_s4 + $0xd8] sm:$0xff]   ;;  %v1789_v39 = vld [vmem:[%s2301_s4 + $0xe0] sm:$0xff]   ;;  %v1792_v42 = vld [vmem:[%s2301_s4 + $0x28] sm:$0xff]  }
   0xe   :  { %v1786_v35 = vld [vmem:[%s2301_s4 + $0x98] sm:$0xff]   ;;  %v1790_v40 = vld [vmem:[%s2301_s4 + $0xa0] sm:$0xff]   ;;  %v1793_v43 = vld [vmem:[%s2301_s4 + $0xe8] sm:$0xff]  }
   0xf   :  { %239 = vmatpush1.bf16.msra.mxu0 %v1761_v15  ;;  %352 = vmatpush1.bf16.msra.mxu1 %v1762_v16  ;;  %v1766_v38 = vld [vmem:[%s2300_s0 + $0x18] sm:$0xff]   ;;  %v1794_v44 = vld [vmem:[%s2301_s4 + $0xa8] sm:$0xff]   ;;  %v1795_v45 = vld [vmem:[%s2301_s4 + $0x70] sm:$0xff]  }
  0x10   :  { %1514 = vmatprep.subr.bf16.mxu0 %v1771_v18  ;;  %1578 = vmatprep.subr.bf16.mxu1 %v1773_v21  ;;  %v1796_v46 = vld [vmem:[%s2301_s4 + $0x30] sm:$0xff]   ;;  %v1767_v48 = vld [vmem:[%s2300_s0 + $0x20] sm:$0xff]   ;;  %v1768_v50 = vld [vmem:[%s2300_s0 + $0x28] sm:$0xff]  }
  0x11   :  { %v1797_v47 = vld [vmem:[%s2301_s4 + $0xf0] sm:$0xff]   ;;  %v1770_v52 = vld [vmem:[%s2300_s0 + $0x38] sm:$0xff]   ;;  %v2073_v57 = vld [vmem:[%s2302_s5] sm:$0xff]  }
  0x12   :  { %1448 = vmatmul.mubr.msk.bf16.vlgmr.msra.gmra.mrb[0].mxu0 %vm207_vm0, %v1763_v17  ;;  %1456 = vmatmul.mubr.msk.bf16.vlgmr.msra.gmra.mrb[0].mxu1 %vm207_vm0, %v1763_v17  ;;  %v1798_v49 = vld [vmem:[%s2301_s4 + $0xb0] sm:$0xff]   ;;  %v1799_v53 = vld [vmem:[%s2301_s4 + $0x78] sm:$0xff]   ;;  %v65_v62 = vld [vmem:[%s2303_s3] sm:$0xf] }
  0x13   :  { %274 = vmatprep.mubr.bf16.mxu0 %v1819_v1  ;;  %387 = vmatprep.mubr.bf16.mxu1 %v1819_v1  ;;  %v1769_v51 = vld [vmem:[%s2300_s0 + $0x30] sm:$0xff]   ;;  %v1801_v54 = vld [vmem:[%s2301_s4 + $0xf8] sm:$0xff]   ;;  %v2081_v2 = vrot.slane %v65_v62, %v77_v61  ;;  %v2083_v3 = vrot.slane %v65_v62, %v73_v63  ;;  %v2085_v4 = vrot.slane %v65_v62, %v81_v0 }
  0x14   :  { %1515 = vmatpush3.bf16.msra.mxu0 %v1772_v19  ;;  %1579 = vmatpush3.bf16.msra.mxu1 %v1774_v22  ;;  %v1800_v55 = vld [vmem:[%s2301_s4 + $0x38] sm:$0xff]  }
  0x15   :  { %1516 = vmatprep.subr.bf16.mxu0 %v1775_v23  ;;  %1580 = vmatprep.subr.bf16.mxu1 %v1777_v25  ;;  %v1802_v56 = vld [vmem:[%s2301_s4 + $0xb8] sm:$0xff]  }
  0x18   :  { %1517 = vmatpush3.bf16.msra.mxu0 %v1776_v24  ;;  %1581 = vmatpush3.bf16.msra.mxu1 %v1778_v26 }
  0x19   :  { %1518 = vmatprep.subr.bf16.mxu0 %v1779_v27  ;;  %1582 = vmatprep.subr.bf16.mxu1 %v1781_v30 }
  0x1a   :  { %1449 = vmatmul.mubr.msk.bf16.gmra.mrb[4].mxu0 %vm207_vm0, %v1764_v20  ;;  %1457 = vmatmul.mubr.msk.bf16.gmra.mrb[4].mxu1 %vm207_vm0, %v1764_v20 }
  0x1b   :  { %284 = vmatprep.mubr.bf16.mxu0 %v1819_v1  ;;  %397 = vmatprep.mubr.bf16.mxu1 %v1819_v1 }
  0x1c   :  { %1519 = vmatpush3.bf16.msra.mxu0 %v1780_v28  ;;  %1583 = vmatpush3.bf16.msra.mxu1 %v1782_v31 }
  0x1d   :  { %1520 = vmatprep.subr.bf16.mxu0 %v1783_v32  ;;  %1584 = vmatprep.subr.bf16.mxu1 %v1785_v34 }
  0x20   :  { %1521 = vmatpush3.bf16.msra.mxu0 %v1784_v33  ;;  %1585 = vmatpush3.bf16.msra.mxu1 %v1786_v35 }
  0x21   :  { %1522 = vmatprep.subr.bf16.mxu0 %v1787_v36  ;;  %1586 = vmatprep.subr.bf16.mxu1 %v1789_v39  ;;  %v1804_v39 = vld [vmem:[%s2302_s5 + $0x8] sm:$0xff]  }
  0x22   :  { %1450 = vmatmul.mubr.msk.bf16.gmra.mrb[8].mxu0 %vm207_vm0, %v1765_v29  ;;  %1458 = vmatmul.mubr.msk.bf16.gmra.mrb[8].mxu1 %vm207_vm0, %v1765_v29 }
  0x23   :  { %294 = vmatprep.mubr.bf16.mxu0 %v1819_v1  ;;  %407 = vmatprep.mubr.bf16.mxu1 %v1819_v1 }
  0x24   :  { %1523 = vmatpush3.bf16.msra.mxu0 %v1788_v37  ;;  %1587 = vmatpush3.bf16.msra.mxu1 %v1790_v40 }
  0x25   :  { %1524 = vmatprep.subr.bf16.mxu0 %v1791_v41  ;;  %1588 = vmatprep.subr.bf16.mxu1 %v1793_v43 }
  0x28   :  { %1525 = vmatpush3.bf16.msra.mxu0 %v1792_v42  ;;  %1589 = vmatpush3.bf16.msra.mxu1 %v1794_v44 }
  0x29   :  { %1526 = vmatprep.subr.bf16.mxu0 %v1795_v45  ;;  %1590 = vmatprep.subr.bf16.mxu1 %v1797_v47 }
  0x2a   :  { %1451 = vmatmul.mubr.msk.bf16.gmra.mrb[12].mxu0 %vm207_vm0, %v1766_v38  ;;  %1459 = vmatmul.mubr.msk.bf16.gmra.mrb[12].mxu1 %vm207_vm0, %v1766_v38 }
  0x2b   :  { %304 = vmatprep.mubr.bf16.mxu0 %v1819_v1  ;;  %417 = vmatprep.mubr.bf16.mxu1 %v1819_v1 }
  0x2c   :  { %1527 = vmatpush3.bf16.msra.mxu0 %v1796_v46  ;;  %1591 = vmatpush3.bf16.msra.mxu1 %v1798_v49 }
  0x2d   :  { %1528 = vmatprep.subr.bf16.mxu0 %v1799_v53  ;;  %1592 = vmatprep.subr.bf16.mxu1 %v1801_v54 }
  0x30   :  { %1529 = vmatpush3.bf16.msra.mxu0 %v1800_v55  ;;  %1593 = vmatpush3.bf16.msra.mxu1 %v1802_v56  ;;  %v1805_v55 = vld [vmem:[%s2302_s5 + $0x10] sm:$0xff]  }
  0x31   :  { %1674 = vmatprep.subr.bf16.mxu0 %v2073_v57 }
  0x32   :  { %1452 = vmatmul.mubr.msk.bf16.gmra.mrb[16].mxu0 %vm207_vm0, %v1767_v48  ;;  %1460 = vmatmul.mubr.msk.bf16.gmra.mrb[16].mxu1 %vm207_vm0, %v1767_v48 }
  0x33   :  { %314 = vmatprep.mubr.bf16.mxu0 %v1819_v1  ;;  %427 = vmatprep.mubr.bf16.mxu1 %v1819_v1 }
  0x3a   :  { %1453 = vmatmul.mubr.msk.bf16.gmra.mrb[20].mxu0 %vm207_vm0, %v1768_v50  ;;  %1461 = vmatmul.mubr.msk.bf16.gmra.mrb[20].mxu1 %vm207_vm0, %v1768_v50 }
  0x3b   :  { %324 = vmatprep.mubr.bf16.mxu0 %v1819_v1  ;;  %437 = vmatprep.mubr.bf16.mxu1 %v1819_v1 }
  0x42   :  { %1454 = vmatmul.mubr.msk.bf16.gmra.mrb[24].mxu0 %vm207_vm0, %v1769_v51  ;;  %1462 = vmatmul.mubr.msk.bf16.gmra.mrb[24].mxu1 %vm207_vm0, %v1769_v51 }
  0x43   :  { %334 = vmatprep.mubr.bf16.mxu0 %v1819_v1  ;;  %447 = vmatprep.mubr.bf16.mxu1 %v1819_v1  ;;  %v2079_v1 = vrot.slane %v65_v62, %v69_v60 }
  0x4a   :  { %1455 = vmatmul.mubr.msk.bf16.gmra.mrb[28].mxu0 %vm207_vm0, %v1770_v52  ;;  %1463 = vmatmul.mubr.msk.bf16.gmra.mrb[28].mxu1 %vm207_vm0, %v1770_v52 }
  0xe5   :  { %v266_v5 = vpop.f32.mrb[0].mxu0  ;;  %v379_v6 = vpop.f32.mrb[0].mxu1 }
  0xe6   :  { %v267_v7 = vadd.f32 %v266_v5, %v2079_v1  ;;  %v380_v8 = vadd.f32 %v379_v6, %v2081_v2  ;;  %v268_v9 = vpop.f32.mrb[1].mxu0  ;;  %v381_v10 = vpop.f32.mrb[1].mxu1 }
  0xe7   :  { %v269_v11 = vadd.f32 %v268_v9, %v2083_v3  ;;  %v382_v12 = vadd.f32 %v381_v10, %v2085_v4  ;;  %v270_v13 = vpop.f32.mrb[2].mxu0  ;;  %v383_v14 = vpop.f32.mrb[2].mxu1 }
  0xe8   :  { %v460_v15 = vmax.f32 %v380_v8, 0.0  ;;  %v271_v16 = vadd.f32 %v270_v13, %v2079_v1  ;;  %v384_v17 = vadd.f32 %v383_v14, %v2081_v2  ;;  %v272_v18 = vpop.f32.mrb[3].mxu0  ;;  %v385_v19 = vpop.f32.mrb[3].mxu1  ;;  %v458_v23 = vmax.f32 %v267_v7, 0.0 }
  0xe9   :  { %v461_v20 = vmax.f32 %v382_v12, 0.0  ;;  %v273_v21 = vadd.f32 %v272_v18, %v2083_v3  ;;  %v386_v22 = vadd.f32 %v385_v19, %v2085_v4  ;;  %v459_v26 = vmax.f32 %v269_v11, 0.0 }
  0xea   :  { %v462_v24 = vmax.f32 %v271_v16, 0.0  ;;  %v464_v25 = vmax.f32 %v384_v17, 0.0 }
  0xeb   :  { %v463_v27 = vmax.f32 %v273_v21, 0.0  ;;  %v465_v28 = vmax.f32 %v386_v22, 0.0 }
  0xec   :  { %v522_v29 = vpack.c.bf16 %v462_v24, %v458_v23  ;;  %v524_v30 = vpack.c.bf16 %v464_v25, %v460_v15 }
  0xed   :  { %v523_v31 = vpack.c.bf16 %v463_v27, %v459_v26  ;;  %v525_v32 = vpack.c.bf16 %v465_v28, %v461_v20  ;;  %v276_v33 = vpop.f32.mrb[4].mxu0  ;;  %v389_v34 = vpop.f32.mrb[4].mxu1 }
  0xee   :  { %v277_v35 = vadd.f32 %v276_v33, %v2079_v1  ;;  %v390_v36 = vadd.f32 %v389_v34, %v2081_v2  ;;  %v278_v37 = vpop.f32.mrb[5].mxu0  ;;  %v391_v38 = vpop.f32.mrb[5].mxu1 }
  0xef   :  { %v279_v40 = vadd.f32 %v278_v37, %v2083_v3  ;;  %v392_v41 = vadd.f32 %v391_v38, %v2085_v4  ;;  %v280_v42 = vpop.f32.mrb[6].mxu0  ;;  %v393_v43 = vpop.f32.mrb[6].mxu1  ;;  %858 = vmatprep.mubr.bf16.mxu0 %v523_v31  ;;  %955 = vmatprep.mubr.bf16.mxu1 %v525_v32 }
  0xf0   :  { %v468_v44 = vmax.f32 %v390_v36, 0.0  ;;  %v281_v45 = vadd.f32 %v280_v42, %v2079_v1  ;;  %v394_v46 = vadd.f32 %v393_v43, %v2081_v2  ;;  %v282_v47 = vpop.f32.mrb[7].mxu0  ;;  %v395_v48 = vpop.f32.mrb[7].mxu1  ;;  %859 = vmatmul.mubr.bf16.vlgmr.msra.gmra.mrb[32].mxu0 %v522_v29  ;;  %956 = vmatmul.mubr.bf16.vlgmr.msra.gmra.mrb[32].mxu1 %v524_v30  ;;  %v466_v52 = vmax.f32 %v277_v35, 0.0 }
  0xf1   :  { %v469_v49 = vmax.f32 %v392_v41, 0.0  ;;  %v283_v50 = vadd.f32 %v282_v47, %v2083_v3  ;;  %v396_v51 = vadd.f32 %v395_v48, %v2085_v4  ;;  %1675 = vmatpush3.bf16.msra.mxu0 %v2073_v57  ;;  %v467_v56 = vmax.f32 %v279_v40, 0.0 }
  0xf2   :  { %v470_v53 = vmax.f32 %v281_v45, 0.0  ;;  %v472_v54 = vmax.f32 %v394_v46, 0.0  ;;  %1676 = vmatprep.subr.bf16.mxu0 %v1804_v39 }
  0xf3   :  { %v471_v58 = vmax.f32 %v283_v50, 0.0  ;;  %v473_v59 = vmax.f32 %v396_v51, 0.0 }
  0xf4   :  { %v526_v60 = vpack.c.bf16 %v470_v53, %v466_v52  ;;  %v528_v61 = vpack.c.bf16 %v472_v54, %v468_v44 }
  0xf5   :  { %v527_v62 = vpack.c.bf16 %v471_v58, %v467_v56  ;;  %v529_v63 = vpack.c.bf16 %v473_v59, %v469_v49  ;;  %v286_v0 = vpop.f32.mrb[8].mxu0  ;;  %v399_v5 = vpop.f32.mrb[8].mxu1  ;;  %1677 = vmatpush3.bf16.msra.mxu0 %v1804_v39 }
  0xf6   :  { %v287_v57 = vadd.f32 %v286_v0, %v2079_v1  ;;  %v400_v6 = vadd.f32 %v399_v5, %v2081_v2  ;;  %v288_v7 = vpop.f32.mrb[9].mxu0  ;;  %v401_v8 = vpop.f32.mrb[9].mxu1  ;;  %1678 = vmatprep.subr.bf16.mxu0 %v1805_v55 }
  0xf7   :  { %v289_v9 = vadd.f32 %v288_v7, %v2083_v3  ;;  %v402_v10 = vadd.f32 %v401_v8, %v2085_v4  ;;  %v290_v11 = vpop.f32.mrb[10].mxu0  ;;  %v403_v12 = vpop.f32.mrb[10].mxu1  ;;  %866 = vmatprep.mubr.bf16.mxu0 %v527_v62  ;;  %963 = vmatprep.mubr.bf16.mxu1 %v529_v63 }
  0xf8   :  { %v476_v13 = vmax.f32 %v400_v6, 0.0  ;;  %v291_v14 = vadd.f32 %v290_v11, %v2079_v1  ;;  %v404_v15 = vadd.f32 %v403_v12, %v2081_v2  ;;  %v292_v16 = vpop.f32.mrb[11].mxu0  ;;  %v405_v17 = vpop.f32.mrb[11].mxu1  ;;  %867 = vmatmul.mubr.bf16.gmra.mrb[36].mxu0 %v526_v60  ;;  %964 = vmatmul.mubr.bf16.gmra.mrb[36].mxu1 %v528_v61  ;;  %v474_v21 = vmax.f32 %v287_v57, 0.0 }
  0xf9   :  { %v477_v18 = vmax.f32 %v402_v10, 0.0  ;;  %v293_v19 = vadd.f32 %v292_v16, %v2083_v3  ;;  %v406_v20 = vadd.f32 %v405_v17, %v2085_v4  ;;  %1679 = vmatpush3.bf16.msra.mxu0 %v1805_v55  ;;  %v475_v24 = vmax.f32 %v289_v9, 0.0 }
  0xfa   :  { %v478_v22 = vmax.f32 %v291_v14, 0.0  ;;  %v480_v23 = vmax.f32 %v404_v15, 0.0 }
  0xfb   :  { %v479_v25 = vmax.f32 %v293_v19, 0.0  ;;  %v481_v26 = vmax.f32 %v406_v20, 0.0 }
  0xfc   :  { %v530_v27 = vpack.c.bf16 %v478_v22, %v474_v21  ;;  %v532_v28 = vpack.c.bf16 %v480_v23, %v476_v13 }
  0xfd   :  { %v531_v29 = vpack.c.bf16 %v479_v25, %v475_v24  ;;  %v533_v30 = vpack.c.bf16 %v481_v26, %v477_v18  ;;  %v296_v31 = vpop.f32.mrb[12].mxu0  ;;  %v409_v32 = vpop.f32.mrb[12].mxu1 }
  0xfe   :  { %v297_v33 = vadd.f32 %v296_v31, %v2079_v1  ;;  %v410_v34 = vadd.f32 %v409_v32, %v2081_v2  ;;  %v298_v35 = vpop.f32.mrb[13].mxu0  ;;  %v411_v36 = vpop.f32.mrb[13].mxu1 }
  0xff   :  { %v299_v37 = vadd.f32 %v298_v35, %v2083_v3  ;;  %v412_v38 = vadd.f32 %v411_v36, %v2085_v4  ;;  %v300_v39 = vpop.f32.mrb[14].mxu0  ;;  %v413_v40 = vpop.f32.mrb[14].mxu1  ;;  %874 = vmatprep.mubr.bf16.mxu0 %v531_v29  ;;  %971 = vmatprep.mubr.bf16.mxu1 %v533_v30 }
 0x100   :  { %v484_v41 = vmax.f32 %v410_v34, 0.0  ;;  %v301_v42 = vadd.f32 %v300_v39, %v2079_v1  ;;  %v414_v43 = vadd.f32 %v413_v40, %v2081_v2  ;;  %v302_v44 = vpop.f32.mrb[15].mxu0  ;;  %v415_v45 = vpop.f32.mrb[15].mxu1  ;;  %875 = vmatmul.mubr.bf16.gmra.mrb[40].mxu0 %v530_v27  ;;  %972 = vmatmul.mubr.bf16.gmra.mrb[40].mxu1 %v532_v28  ;;  %v482_v49 = vmax.f32 %v297_v33, 0.0 }
 0x101   :  { %v485_v46 = vmax.f32 %v412_v38, 0.0  ;;  %v303_v47 = vadd.f32 %v302_v44, %v2083_v3  ;;  %v416_v48 = vadd.f32 %v415_v45, %v2085_v4  ;;  %v483_v52 = vmax.f32 %v299_v37, 0.0 }
 0x102   :  { %v486_v50 = vmax.f32 %v301_v42, 0.0  ;;  %v488_v51 = vmax.f32 %v414_v43, 0.0 }
 0x103   :  { %v487_v53 = vmax.f32 %v303_v47, 0.0  ;;  %v489_v54 = vmax.f32 %v416_v48, 0.0 }
 0x104   :  { %v534_v55 = vpack.c.bf16 %v486_v50, %v482_v49  ;;  %v536_v56 = vpack.c.bf16 %v488_v51, %v484_v41 }
 0x105   :  { %v535_v58 = vpack.c.bf16 %v487_v53, %v483_v52  ;;  %v537_v59 = vpack.c.bf16 %v489_v54, %v485_v46  ;;  %v306_v60 = vpop.f32.mrb[16].mxu0  ;;  %v419_v61 = vpop.f32.mrb[16].mxu1 }
 0x106   :  { %v307_v62 = vadd.f32 %v306_v60, %v2079_v1  ;;  %v420_v63 = vadd.f32 %v419_v61, %v2081_v2  ;;  %v308_v0 = vpop.f32.mrb[17].mxu0  ;;  %v421_v5 = vpop.f32.mrb[17].mxu1 }
 0x107   :  { %v309_v57 = vadd.f32 %v308_v0, %v2083_v3  ;;  %v422_v6 = vadd.f32 %v421_v5, %v2085_v4  ;;  %v310_v7 = vpop.f32.mrb[18].mxu0  ;;  %v423_v8 = vpop.f32.mrb[18].mxu1  ;;  %882 = vmatprep.mubr.bf16.mxu0 %v535_v58  ;;  %979 = vmatprep.mubr.bf16.mxu1 %v537_v59 }
 0x108   :  { %v492_v9 = vmax.f32 %v420_v63, 0.0  ;;  %v311_v10 = vadd.f32 %v310_v7, %v2079_v1  ;;  %v424_v11 = vadd.f32 %v423_v8, %v2081_v2  ;;  %v312_v12 = vpop.f32.mrb[19].mxu0  ;;  %v425_v13 = vpop.f32.mrb[19].mxu1  ;;  %883 = vmatmul.mubr.bf16.gmra.mrb[44].mxu0 %v534_v55  ;;  %980 = vmatmul.mubr.bf16.gmra.mrb[44].mxu1 %v536_v56  ;;  %v490_v17 = vmax.f32 %v307_v62, 0.0 }
 0x109   :  { %v493_v14 = vmax.f32 %v422_v6, 0.0  ;;  %v313_v15 = vadd.f32 %v312_v12, %v2083_v3  ;;  %v426_v16 = vadd.f32 %v425_v13, %v2085_v4  ;;  %v491_v20 = vmax.f32 %v309_v57, 0.0 }
 0x10a   :  { %v494_v18 = vmax.f32 %v311_v10, 0.0  ;;  %v496_v19 = vmax.f32 %v424_v11, 0.0 }
 0x10b   :  { %v495_v21 = vmax.f32 %v313_v15, 0.0  ;;  %v497_v22 = vmax.f32 %v426_v16, 0.0 }
 0x10c   :  { %v538_v23 = vpack.c.bf16 %v494_v18, %v490_v17  ;;  %v540_v24 = vpack.c.bf16 %v496_v19, %v492_v9 }
 0x10d   :  { %v539_v25 = vpack.c.bf16 %v495_v21, %v491_v20  ;;  %v541_v26 = vpack.c.bf16 %v497_v22, %v493_v14  ;;  %v316_v27 = vpop.f32.mrb[20].mxu0  ;;  %v429_v28 = vpop.f32.mrb[20].mxu1 }
 0x10e   :  { %v317_v29 = vadd.f32 %v316_v27, %v2079_v1  ;;  %v430_v30 = vadd.f32 %v429_v28, %v2081_v2  ;;  %v318_v31 = vpop.f32.mrb[21].mxu0  ;;  %v431_v32 = vpop.f32.mrb[21].mxu1 }
 0x10f   :  { %v319_v33 = vadd.f32 %v318_v31, %v2083_v3  ;;  %v432_v34 = vadd.f32 %v431_v32, %v2085_v4  ;;  %v320_v35 = vpop.f32.mrb[22].mxu0  ;;  %v433_v36 = vpop.f32.mrb[22].mxu1  ;;  %890 = vmatprep.mubr.bf16.mxu0 %v539_v25  ;;  %987 = vmatprep.mubr.bf16.mxu1 %v541_v26 }
 0x110   :  { %v500_v37 = vmax.f32 %v430_v30, 0.0  ;;  %v321_v38 = vadd.f32 %v320_v35, %v2079_v1  ;;  %v434_v39 = vadd.f32 %v433_v36, %v2081_v2  ;;  %v322_v40 = vpop.f32.mrb[23].mxu0  ;;  %v435_v41 = vpop.f32.mrb[23].mxu1  ;;  %891 = vmatmul.mubr.bf16.gmra.mrb[48].mxu0 %v538_v23  ;;  %988 = vmatmul.mubr.bf16.gmra.mrb[48].mxu1 %v540_v24  ;;  %v498_v45 = vmax.f32 %v317_v29, 0.0 }
 0x111   :  { %v501_v42 = vmax.f32 %v432_v34, 0.0  ;;  %v323_v43 = vadd.f32 %v322_v40, %v2083_v3  ;;  %v436_v44 = vadd.f32 %v435_v41, %v2085_v4  ;;  %v499_v48 = vmax.f32 %v319_v33, 0.0 }
 0x112   :  { %v502_v46 = vmax.f32 %v321_v38, 0.0  ;;  %v504_v47 = vmax.f32 %v434_v39, 0.0 }
 0x113   :  { %v503_v49 = vmax.f32 %v323_v43, 0.0  ;;  %v505_v50 = vmax.f32 %v436_v44, 0.0 }
 0x114   :  { %v542_v51 = vpack.c.bf16 %v502_v46, %v498_v45  ;;  %v544_v52 = vpack.c.bf16 %v504_v47, %v500_v37 }
 0x115   :  { %v543_v53 = vpack.c.bf16 %v503_v49, %v499_v48  ;;  %v545_v54 = vpack.c.bf16 %v505_v50, %v501_v42  ;;  %v326_v55 = vpop.f32.mrb[24].mxu0  ;;  %v439_v56 = vpop.f32.mrb[24].mxu1  ;;  %v1809_v50 = vld [vmem:[%s2302_s5 + $0x30] sm:$0xff]  }
 0x116   :  { %v327_v58 = vadd.f32 %v326_v55, %v2079_v1  ;;  %v440_v59 = vadd.f32 %v439_v56, %v2081_v2  ;;  %v328_v60 = vpop.f32.mrb[25].mxu0  ;;  %v441_v61 = vpop.f32.mrb[25].mxu1  ;;  %v1814_v55 = vld [vmem:[%s2304_s7 + $0x18] sm:$0xff]   ;;  %v1815_v56 = vld [vmem:[%s2304_s7 + $0x20] sm:$0xff]  }
 0x117   :  { %v329_v62 = vadd.f32 %v328_v60, %v2083_v3  ;;  %v442_v63 = vadd.f32 %v441_v61, %v2085_v4  ;;  %v330_v0 = vpop.f32.mrb[26].mxu0  ;;  %v443_v5 = vpop.f32.mrb[26].mxu1  ;;  %898 = vmatprep.mubr.bf16.mxu0 %v543_v53  ;;  %995 = vmatprep.mubr.bf16.mxu1 %v545_v54  ;;  %v1812_v53 = vld [vmem:[%s2304_s7 + $0x8] sm:$0xff]   ;;  %v1813_v54 = vld [vmem:[%s2304_s7 + $0x10] sm:$0xff]   ;;  %v618_v61 = vld [vmem:[%s2305_s1] sm:$0xff] }
 0x118   :  { %v508_v57 = vmax.f32 %v440_v59, 0.0  ;;  %v331_v6 = vadd.f32 %v330_v0, %v2079_v1  ;;  %v444_v7 = vadd.f32 %v443_v5, %v2081_v2  ;;  %v332_v8 = vpop.f32.mrb[27].mxu0  ;;  %v445_v9 = vpop.f32.mrb[27].mxu1  ;;  %899 = vmatmul.mubr.bf16.gmra.mrb[52].mxu0 %v542_v51  ;;  %996 = vmatmul.mubr.bf16.gmra.mrb[52].mxu1 %v544_v52  ;;  %v506_v13 = vmax.f32 %v327_v58, 0.0  ;;  %v1810_v51 = vld [vmem:[%s2302_s5 + $0x38] sm:$0xff]   ;;  %v1811_v52 = vld [vmem:[%s2304_s7] sm:$0xff]  }
 0x119   :  { %v509_v10 = vmax.f32 %v442_v63, 0.0  ;;  %v333_v11 = vadd.f32 %v332_v8, %v2083_v3  ;;  %v446_v12 = vadd.f32 %v445_v9, %v2085_v4  ;;  %v507_v16 = vmax.f32 %v329_v62, 0.0  ;;  %1706 = vmatprep.subr.bf16.mxu1 %v1811_v52  ;;  %v1816_v58 = vld [vmem:[%s2304_s7 + $0x28] sm:$0xff]  }
 0x11a   :  { %v510_v14 = vmax.f32 %v331_v6, 0.0  ;;  %v512_v15 = vmax.f32 %v444_v7, 0.0  ;;  %1707 = vmatpush3.bf16.msra.mxu1 %v1811_v52  ;;  %v619_v7 = vld [vmem:[%s2305_s1 + $0x8] sm:$0xff] }
 0x11b   :  { %v511_v17 = vmax.f32 %v333_v11, 0.0  ;;  %v513_v18 = vmax.f32 %v446_v12, 0.0  ;;  %1708 = vmatprep.subr.bf16.mxu1 %v1812_v53 }
 0x11c   :  { %v546_v19 = vpack.c.bf16 %v510_v14, %v506_v13  ;;  %v548_v20 = vpack.c.bf16 %v512_v15, %v508_v57 }
 0x11d   :  { %v547_v21 = vpack.c.bf16 %v511_v17, %v507_v16  ;;  %v549_v22 = vpack.c.bf16 %v513_v18, %v509_v10  ;;  %v336_v23 = vpop.f32.mrb[28].mxu0  ;;  %v449_v24 = vpop.f32.mrb[28].mxu1  ;;  %v620_v18 = vld [vmem:[%s2305_s1 + $0x10] sm:$0xff] }
 0x11e   :  { %v337_v25 = vadd.f32 %v336_v23, %v2079_v1  ;;  %v450_v26 = vadd.f32 %v449_v24, %v2081_v2  ;;  %v338_v27 = vpop.f32.mrb[29].mxu0  ;;  %v451_v28 = vpop.f32.mrb[29].mxu1  ;;  %1709 = vmatpush3.bf16.msra.mxu1 %v1812_v53 }
 0x11f   :  { %v339_v29 = vadd.f32 %v338_v27, %v2083_v3  ;;  %v452_v30 = vadd.f32 %v451_v28, %v2085_v4  ;;  %v340_v31 = vpop.f32.mrb[30].mxu0  ;;  %v453_v32 = vpop.f32.mrb[30].mxu1  ;;  %906 = vmatprep.mubr.bf16.mxu0 %v547_v21  ;;  %1003 = vmatprep.mubr.bf16.mxu1 %v549_v22  ;;  %v621_v27 = vld [vmem:[%s2305_s1 + $0x18] sm:$0xff] }
 0x120   :  { %v516_v33 = vmax.f32 %v450_v26, 0.0  ;;  %v341_v34 = vadd.f32 %v340_v31, %v2079_v1  ;;  %v454_v35 = vadd.f32 %v453_v32, %v2081_v2  ;;  %v342_v36 = vpop.f32.mrb[31].mxu0  ;;  %v455_v37 = vpop.f32.mrb[31].mxu1  ;;  %907 = vmatmul.mubr.bf16.gmra.mrb[56].mxu0 %v546_v19  ;;  %1004 = vmatmul.mubr.bf16.gmra.mrb[56].mxu1 %v548_v20  ;;  %v514_v41 = vmax.f32 %v337_v25, 0.0  ;;  %v1806_v2 = vld [vmem:[%s2302_s5 + $0x18] sm:$0xff]  }
 0x121   :  { %v517_v38 = vmax.f32 %v452_v30, 0.0  ;;  %v343_v39 = vadd.f32 %v342_v36, %v2083_v3  ;;  %v456_v40 = vadd.f32 %v455_v37, %v2085_v4  ;;  %v515_v44 = vmax.f32 %v339_v29, 0.0  ;;  %1680 = vmatprep.subr.bf16.mxu0 %v1806_v2  ;;  %v1807_v3 = vld [vmem:[%s2302_s5 + $0x20] sm:$0xff]   ;;  %v1808_v4 = vld [vmem:[%s2302_s5 + $0x28] sm:$0xff]   ;;  %1710 = vmatprep.subr.bf16.mxu1 %v1813_v54 }
 0x122   :  { %v518_v42 = vmax.f32 %v341_v34, 0.0  ;;  %v520_v43 = vmax.f32 %v454_v35, 0.0  ;;  %1681 = vmatpush3.bf16.msra.mxu0 %v1806_v2  ;;  %1711 = vmatpush3.bf16.msra.mxu1 %v1813_v54 }
 0x123   :  { %v519_v45 = vmax.f32 %v343_v39, 0.0  ;;  %v521_v46 = vmax.f32 %v456_v40, 0.0  ;;  %1682 = vmatprep.subr.bf16.mxu0 %v1807_v3  ;;  %1712 = vmatprep.subr.bf16.mxu1 %v1814_v55  ;;  %v622_v39 = vld [vmem:[%s2305_s1 + $0x20] sm:$0xff] }
 0x124   :  { %v550_v47 = vpack.c.bf16 %v518_v42, %v514_v41  ;;  %v552_v48 = vpack.c.bf16 %v520_v43, %v516_v33 }
 0x125   :  { %v551_v1 = vpack.c.bf16 %v519_v45, %v515_v44  ;;  %v553_v49 = vpack.c.bf16 %v521_v46, %v517_v38 }
 0x126   :  { %1683 = vmatpush3.bf16.msra.mxu0 %v1807_v3  ;;  %1713 = vmatpush3.bf16.msra.mxu1 %v1814_v55 }
 0x127   :  { %914 = vmatprep.mubr.bf16.mxu0 %v551_v1  ;;  %1011 = vmatprep.mubr.bf16.mxu1 %v553_v49 }
 0x128   :  { %915 = vmatmul.mubr.bf16.gmra.mrb[60].mxu0 %v550_v47  ;;  %1012 = vmatmul.mubr.bf16.gmra.mrb[60].mxu1 %v552_v48  ;;  %v623_v48 = vld [vmem:[%s2305_s1 + $0x28] sm:$0xff] }
 0x129   :  { %1684 = vmatprep.subr.bf16.mxu0 %v1808_v4  ;;  %1714 = vmatprep.subr.bf16.mxu1 %v1815_v56 }
 0x12a   :  { %1685 = vmatpush3.bf16.msra.mxu0 %v1808_v4  ;;  %1715 = vmatpush3.bf16.msra.mxu1 %v1815_v56  ;;  %v624_v56 = vld [vmem:[%s2305_s1 + $0x30] sm:$0xff] }
 0x12b   :  { %1686 = vmatprep.subr.bf16.mxu0 %v1809_v50  ;;  %1716 = vmatprep.subr.bf16.mxu1 %v1816_v58 }
 0x12e   :  { %1687 = vmatpush3.bf16.msra.mxu0 %v1809_v50  ;;  %1717 = vmatpush3.bf16.msra.mxu1 %v1816_v58 }
 0x12f   :  { %1688 = vmatprep.subr.bf16.mxu0 %v1810_v51 }
 0x132   :  { %1689 = vmatpush3.bf16.msra.mxu0 %v1810_v51 }
 0x1c3   :  { %v1530_v59 = vpop.f32.mrb[32].mxu0  ;;  %v1594_v60 = vpop.f32.mrb[32].mxu1 }
 0x1c4   :  { %v1531_v62 = vpop.f32.mrb[33].mxu0  ;;  %v1595_v63 = vpop.f32.mrb[33].mxu1 }
 0x1c5   :  { %v1532_v0 = vadd.f32 %v1531_v62, %v1530_v59  ;;  %v1596_v5 = vadd.f32 %v1595_v63, %v1594_v60  ;;  %v1533_v57 = vpop.f32.mrb[34].mxu0  ;;  %v1597_v6 = vpop.f32.mrb[34].mxu1 }
 0x1c6   :  { %v1534_v8 = vpop.f32.mrb[35].mxu0  ;;  %v1598_v9 = vpop.f32.mrb[35].mxu1 }
 0x1c7   :  { %v861_v10 = vadd.f32 %v1532_v0, %v618_v61  ;;  %v1535_v11 = vadd.f32 %v1534_v8, %v1533_v57  ;;  %v1599_v12 = vadd.f32 %v1598_v9, %v1597_v6  ;;  %v625_v57 = vld [vmem:[%s2305_s1 + $0x38] sm:$0xff] }
 0x1c9   :  { %v958_v13 = vadd.f32 %v1596_v5, %v861_v10  ;;  %v864_v14 = vadd.f32 %v1535_v11, %v619_v7 }
 0x1cb   :  { %v961_v15 = vadd.f32 %v1599_v12, %v864_v14  ;;  %v1536_v16 = vpop.f32.mrb[36].mxu0  ;;  %v1600_v17 = vpop.f32.mrb[36].mxu1  ;;  %v1020_v21 = vmax.f32 %v958_v13, 0.0 }
 0x1cc   :  { %v1537_v19 = vpop.f32.mrb[37].mxu0  ;;  %v1601_v20 = vpop.f32.mrb[37].mxu1 }
 0x1cd   :  { %v1021_v22 = vmax.f32 %v961_v15, 0.0  ;;  %v1538_v23 = vadd.f32 %v1537_v19, %v1536_v16  ;;  %v1602_v24 = vadd.f32 %v1601_v20, %v1600_v17  ;;  %v1539_v25 = vpop.f32.mrb[38].mxu0  ;;  %v1603_v26 = vpop.f32.mrb[38].mxu1  ;;  %v626_v17 = vld [vmem:[%s2305_s1 + $0x40] sm:$0xff] }
 0x1ce   :  { %v1540_v28 = vpop.f32.mrb[39].mxu0  ;;  %v1604_v29 = vpop.f32.mrb[39].mxu1 }
 0x1cf   :  { %v869_v30 = vadd.f32 %v1538_v23, %v620_v18  ;;  %v1541_v31 = vadd.f32 %v1540_v28, %v1539_v25  ;;  %v1605_v32 = vadd.f32 %v1604_v29, %v1603_v26  ;;  %v1036_v33 = vpack.c.bf16 %v1021_v22, %v1020_v21  ;;  %v627_v26 = vld [vmem:[%s2305_s1 + $0x48] sm:$0xff] }
 0x1d1   :  { %v966_v34 = vadd.f32 %v1602_v24, %v869_v30  ;;  %v872_v35 = vadd.f32 %v1541_v31, %v621_v27  ;;  %1690 = vmatprep.mubr.bf16.mxu0 %v1036_v33 }
 0x1d3   :  { %v969_v36 = vadd.f32 %v1605_v32, %v872_v35  ;;  %v1542_v37 = vpop.f32.mrb[40].mxu0  ;;  %v1606_v38 = vpop.f32.mrb[40].mxu1  ;;  %v1022_v42 = vmax.f32 %v966_v34, 0.0 }
 0x1d4   :  { %v1543_v40 = vpop.f32.mrb[41].mxu0  ;;  %v1607_v41 = vpop.f32.mrb[41].mxu1 }
 0x1d5   :  { %v1023_v43 = vmax.f32 %v969_v36, 0.0  ;;  %v1544_v44 = vadd.f32 %v1543_v40, %v1542_v37  ;;  %v1608_v45 = vadd.f32 %v1607_v41, %v1606_v38  ;;  %v1545_v46 = vpop.f32.mrb[42].mxu0  ;;  %v1609_v47 = vpop.f32.mrb[42].mxu1  ;;  %v628_v38 = vld [vmem:[%s2305_s1 + $0x50] sm:$0xff] }
 0x1d6   :  { %v1546_v1 = vpop.f32.mrb[43].mxu0  ;;  %v1610_v49 = vpop.f32.mrb[43].mxu1 }
 0x1d7   :  { %v1037_v2 = vpack.c.bf16 %v1023_v43, %v1022_v42  ;;  %v877_v3 = vadd.f32 %v1544_v44, %v622_v39  ;;  %v1547_v4 = vadd.f32 %v1546_v1, %v1545_v46  ;;  %v1611_v50 = vadd.f32 %v1610_v49, %v1609_v47  ;;  %v629_v47 = vld [vmem:[%s2305_s1 + $0x58] sm:$0xff] }
 0x1d9   :  { %v974_v51 = vadd.f32 %v1608_v45, %v877_v3  ;;  %v880_v52 = vadd.f32 %v1547_v4, %v623_v48  ;;  %1691 = vmatmul.mubr.bf16.vlgmr.msra.gmra.mrb[64].mxu0 %v1037_v2 }
 0x1db   :  { %v977_v53 = vadd.f32 %v1611_v50, %v880_v52  ;;  %v1548_v54 = vpop.f32.mrb[44].mxu0  ;;  %v1612_v55 = vpop.f32.mrb[44].mxu1  ;;  %v1024_v60 = vmax.f32 %v974_v51, 0.0 }
 0x1dc   :  { %v1549_v58 = vpop.f32.mrb[45].mxu0  ;;  %v1613_v59 = vpop.f32.mrb[45].mxu1 }
 0x1dd   :  { %v1025_v61 = vmax.f32 %v977_v53, 0.0  ;;  %v1550_v62 = vadd.f32 %v1549_v58, %v1548_v54  ;;  %v1614_v63 = vadd.f32 %v1613_v59, %v1612_v55  ;;  %v1551_v0 = vpop.f32.mrb[46].mxu0  ;;  %v1615_v5 = vpop.f32.mrb[46].mxu1  ;;  %v630_v55 = vld [vmem:[%s2305_s1 + $0x60] sm:$0xff] }
 0x1de   :  { %v1552_v6 = vpop.f32.mrb[47].mxu0  ;;  %v1616_v7 = vpop.f32.mrb[47].mxu1 }
 0x1df   :  { %v885_v8 = vadd.f32 %v1550_v62, %v624_v56  ;;  %v1553_v9 = vadd.f32 %v1552_v6, %v1551_v0  ;;  %v1617_v10 = vadd.f32 %v1616_v7, %v1615_v5  ;;  %v1038_v11 = vpack.c.bf16 %v1025_v61, %v1024_v60  ;;  %v631_v5 = vld [vmem:[%s2305_s1 + $0x68] sm:$0xff] }
 0x1e1   :  { %v982_v12 = vadd.f32 %v1614_v63, %v885_v8  ;;  %v888_v13 = vadd.f32 %v1553_v9, %v625_v57  ;;  %1694 = vmatprep.mubr.bf16.mxu0 %v1038_v11 }
 0x1e3   :  { %v985_v14 = vadd.f32 %v1617_v10, %v888_v13  ;;  %v1554_v15 = vpop.f32.mrb[48].mxu0  ;;  %v1618_v16 = vpop.f32.mrb[48].mxu1  ;;  %v1026_v20 = vmax.f32 %v982_v12, 0.0 }
 0x1e4   :  { %v1555_v18 = vpop.f32.mrb[49].mxu0  ;;  %v1619_v19 = vpop.f32.mrb[49].mxu1 }
 0x1e5   :  { %v1027_v21 = vmax.f32 %v985_v14, 0.0  ;;  %v1556_v22 = vadd.f32 %v1555_v18, %v1554_v15  ;;  %v1620_v23 = vadd.f32 %v1619_v19, %v1618_v16  ;;  %v1557_v24 = vpop.f32.mrb[50].mxu0  ;;  %v1621_v25 = vpop.f32.mrb[50].mxu1  ;;  %v632_v16 = vld [vmem:[%s2305_s1 + $0x70] sm:$0xff] }
 0x1e6   :  { %v1558_v27 = vpop.f32.mrb[51].mxu0  ;;  %v1622_v28 = vpop.f32.mrb[51].mxu1 }
 0x1e7   :  { %v893_v29 = vadd.f32 %v1556_v22, %v626_v17  ;;  %v1559_v30 = vadd.f32 %v1558_v27, %v1557_v24  ;;  %v1623_v31 = vadd.f32 %v1622_v28, %v1621_v25  ;;  %v1039_v32 = vpack.c.bf16 %v1027_v21, %v1026_v20  ;;  %v633_v25 = vld [vmem:[%s2305_s1 + $0x78] sm:$0xff] }
 0x1e9   :  { %v990_v33 = vadd.f32 %v1620_v23, %v893_v29  ;;  %v896_v34 = vadd.f32 %v1559_v30, %v627_v26  ;;  %1695 = vmatmul.mubr.bf16.gmra.mrb[68].mxu0 %v1039_v32 }
 0x1eb   :  { %v993_v35 = vadd.f32 %v1623_v31, %v896_v34  ;;  %v1560_v36 = vpop.f32.mrb[52].mxu0  ;;  %v1624_v37 = vpop.f32.mrb[52].mxu1  ;;  %v1028_v41 = vmax.f32 %v990_v33, 0.0 }
 0x1ec   :  { %v1561_v39 = vpop.f32.mrb[53].mxu0  ;;  %v1625_v40 = vpop.f32.mrb[53].mxu1 }
 0x1ed   :  { %v1029_v42 = vmax.f32 %v993_v35, 0.0  ;;  %v1562_v43 = vadd.f32 %v1561_v39, %v1560_v36  ;;  %v1626_v44 = vadd.f32 %v1625_v40, %v1624_v37  ;;  %v1563_v45 = vpop.f32.mrb[54].mxu0  ;;  %v1627_v46 = vpop.f32.mrb[54].mxu1  ;;  %v1818_v39 = vld [vmem:[%s2304_s7 + $0x38] sm:$0xff]   ;;  %v1496_v40 = vld [vmem:[%s2306_s6] ss:$0 sm:$0xff] }
 0x1ee   :  { %v1564_v48 = vpop.f32.mrb[55].mxu0  ;;  %v1628_v1 = vpop.f32.mrb[55].mxu1 }
 0x1ef   :  { %v901_v49 = vadd.f32 %v1562_v43, %v628_v38  ;;  %v1565_v2 = vadd.f32 %v1564_v48, %v1563_v45  ;;  %v1629_v3 = vadd.f32 %v1628_v1, %v1627_v46  ;;  %v1040_v4 = vpack.c.bf16 %v1029_v42, %v1028_v41  ;;  %v1817_v38 = vld [vmem:[%s2304_s7 + $0x30] sm:$0xff]  }
 0x1f0   :  { %1718 = vmatprep.subr.bf16.mxu1 %v1817_v38 }
 0x1f1   :  { %v998_v50 = vadd.f32 %v1626_v44, %v901_v49  ;;  %v904_v51 = vadd.f32 %v1565_v2, %v629_v47  ;;  %1698 = vmatprep.mubr.bf16.mxu0 %v1040_v4  ;;  %1719 = vmatpush3.bf16.msra.mxu1 %v1817_v38 }
 0x1f2   :  { %1720 = vmatprep.subr.bf16.mxu1 %v1818_v39 }
 0x1f3   :  { %v1001_v52 = vadd.f32 %v1629_v3, %v904_v51  ;;  %v1566_v53 = vpop.f32.mrb[56].mxu0  ;;  %v1630_v54 = vpop.f32.mrb[56].mxu1  ;;  %v1030_v59 = vmax.f32 %v998_v50, 0.0 }
 0x1f4   :  { %v1567_v56 = vpop.f32.mrb[57].mxu0  ;;  %v1631_v58 = vpop.f32.mrb[57].mxu1 }
 0x1f5   :  { %v1031_v60 = vmax.f32 %v1001_v52, 0.0  ;;  %v1568_v61 = vadd.f32 %v1567_v56, %v1566_v53  ;;  %v1632_v62 = vadd.f32 %v1631_v58, %v1630_v54  ;;  %v1569_v63 = vpop.f32.mrb[58].mxu0  ;;  %v1633_v0 = vpop.f32.mrb[58].mxu1  ;;  %1721 = vmatpush3.bf16.msra.mxu1 %v1818_v39 }
 0x1f6   :  { %v1570_v57 = vpop.f32.mrb[59].mxu0  ;;  %v1634_v6 = vpop.f32.mrb[59].mxu1 }
 0x1f7   :  { %v909_v7 = vadd.f32 %v1568_v61, %v630_v55  ;;  %v1571_v8 = vadd.f32 %v1570_v57, %v1569_v63  ;;  %v1635_v9 = vadd.f32 %v1634_v6, %v1633_v0  ;;  %v1041_v10 = vpack.c.bf16 %v1031_v60, %v1030_v59 }
 0x1f9   :  { %v1006_v11 = vadd.f32 %v1632_v62, %v909_v7  ;;  %v912_v12 = vadd.f32 %v1571_v8, %v631_v5  ;;  %1699 = vmatmul.mubr.bf16.gmra.mrb[72].mxu0 %v1041_v10 }
 0x1fb   :  { %v1009_v13 = vadd.f32 %v1635_v9, %v912_v12  ;;  %v1572_v14 = vpop.f32.mrb[60].mxu0  ;;  %v1636_v15 = vpop.f32.mrb[60].mxu1  ;;  %v1032_v19 = vmax.f32 %v1006_v11, 0.0 }
 0x1fc   :  { %v1573_v17 = vpop.f32.mrb[61].mxu0  ;;  %v1637_v18 = vpop.f32.mrb[61].mxu1 }
 0x1fd   :  { %v1033_v20 = vmax.f32 %v1009_v13, 0.0  ;;  %v1574_v21 = vadd.f32 %v1573_v17, %v1572_v14  ;;  %v1638_v22 = vadd.f32 %v1637_v18, %v1636_v15  ;;  %v1575_v23 = vpop.f32.mrb[62].mxu0  ;;  %v1639_v24 = vpop.f32.mrb[62].mxu1 }
 0x1fe   :  { %v1576_v26 = vpop.f32.mrb[63].mxu0  ;;  %v1640_v27 = vpop.f32.mrb[63].mxu1 }
 0x1ff   :  { %v917_v28 = vadd.f32 %v1574_v21, %v632_v16  ;;  %v1577_v29 = vadd.f32 %v1576_v26, %v1575_v23  ;;  %v1641_v30 = vadd.f32 %v1640_v27, %v1639_v24  ;;  %v1042_v31 = vpack.c.bf16 %v1033_v20, %v1032_v19 }
 0x201   :  { %v1014_v32 = vadd.f32 %v1638_v22, %v917_v28  ;;  %v920_v33 = vadd.f32 %v1577_v29, %v633_v25  ;;  %1702 = vmatprep.mubr.bf16.mxu0 %v1042_v31 }
 0x203   :  { %v1017_v34 = vadd.f32 %v1641_v30, %v920_v33  ;;  %v1034_v35 = vmax.f32 %v1014_v32, 0.0  ;;  %v1505_v33 = vld [vmem:[%s2307_s8] ss:$0 sm:$0xff] }
 0x205   :  { %v1035_v36 = vmax.f32 %v1017_v34, 0.0 }
 0x207   :  { %v1043_v37 = vpack.c.bf16 %v1035_v36, %v1034_v35 }
 0x209   :  { %1703 = vmatmul.mubr.bf16.gmra.mrb[76].mxu0 %v1043_v37 }
 0x2ac   :  { %v1692_v41 = vpop.f32.mrb[64].mxu0 }
 0x2ad   :  { %v1158_v42 = vadd.f32 %v1692_v41, %v1496_v40  ;;  %v1149_v43 = vpop.f32.mrb[65].mxu0 }
 0x2ae   :  { %v1150_v44 = vadd.f32 %v1496_v40, %v1149_v43  ;;  %v1693_v45 = vpop.f32.mrb[66].mxu0 }
 0x2af   :  { %v1161_v46 = vadd.f32 %v1693_v45, %v1496_v40  ;;  %v1152_v47 = vpop.f32.mrb[67].mxu0  ;;  %v1214_v1 = vmax.f32 %v1158_v42, 0.0 }
 0x2b0   :  { %v1153_v48 = vadd.f32 %v1496_v40, %v1152_v47  ;;  %v1212_v2 = vmax.f32 %v1150_v44, 0.0 }
 0x2b1   :  { %v1215_v49 = vmax.f32 %v1161_v46, 0.0 }
 0x2b2   :  { %v1213_v3 = vmax.f32 %v1153_v48, 0.0 }
 0x2b3   :  { %v1229_v4 = vpack.c.bf16 %v1215_v49, %v1214_v1 }
 0x2b4   :  { %v1228_v50 = vpack.c.bf16 %v1213_v3, %v1212_v2 }
 0x2b6   :  { %1722 = vmatprep.mubr.bf16.mxu1 %v1228_v50 }
 0x2b7   :  { %1723 = vmatmul.mubr.bf16.vlgmr.msra.gmra.mrb[64].mxu1 %v1229_v4 }
 0x2bc   :  { %v1696_v51 = vpop.f32.mrb[68].mxu0 }
 0x2bd   :  { %v1174_v52 = vadd.f32 %v1696_v51, %v1496_v40  ;;  %v1165_v53 = vpop.f32.mrb[69].mxu0 }
 0x2be   :  { %v1166_v54 = vadd.f32 %v1496_v40, %v1165_v53  ;;  %v1697_v55 = vpop.f32.mrb[70].mxu0 }
 0x2bf   :  { %v1177_v56 = vadd.f32 %v1697_v55, %v1496_v40  ;;  %v1168_v58 = vpop.f32.mrb[71].mxu0  ;;  %v1218_v60 = vmax.f32 %v1174_v52, 0.0 }
 0x2c0   :  { %v1169_v59 = vadd.f32 %v1496_v40, %v1168_v58  ;;  %v1216_v62 = vmax.f32 %v1166_v54, 0.0 }
 0x2c1   :  { %v1219_v61 = vmax.f32 %v1177_v56, 0.0 }
 0x2c2   :  { %v1217_v63 = vmax.f32 %v1169_v59, 0.0 }
 0x2c3   :  { %v1231_v0 = vpack.c.bf16 %v1219_v61, %v1218_v60 }
 0x2c4   :  { %v1230_v5 = vpack.c.bf16 %v1217_v63, %v1216_v62 }
 0x2c6   :  { %1726 = vmatprep.mubr.bf16.mxu1 %v1230_v5 }
 0x2c7   :  { %1727 = vmatmul.mubr.bf16.gmra.mrb[68].mxu1 %v1231_v0 }
 0x2cc   :  { %v1700_v57 = vpop.f32.mrb[72].mxu0 }
 0x2cd   :  { %v1190_v6 = vadd.f32 %v1700_v57, %v1496_v40  ;;  %v1181_v7 = vpop.f32.mrb[73].mxu0 }
 0x2ce   :  { %v1182_v8 = vadd.f32 %v1496_v40, %v1181_v7  ;;  %v1701_v9 = vpop.f32.mrb[74].mxu0 }
 0x2cf   :  { %v1193_v10 = vadd.f32 %v1701_v9, %v1496_v40  ;;  %v1184_v11 = vpop.f32.mrb[75].mxu0  ;;  %v1222_v13 = vmax.f32 %v1190_v6, 0.0 }
 0x2d0   :  { %v1185_v12 = vadd.f32 %v1496_v40, %v1184_v11  ;;  %v1220_v15 = vmax.f32 %v1182_v8, 0.0 }
 0x2d1   :  { %v1223_v14 = vmax.f32 %v1193_v10, 0.0 }
 0x2d2   :  { %v1221_v16 = vmax.f32 %v1185_v12, 0.0 }
 0x2d3   :  { %v1233_v17 = vpack.c.bf16 %v1223_v14, %v1222_v13 }
 0x2d4   :  { %v1232_v18 = vpack.c.bf16 %v1221_v16, %v1220_v15 }
 0x2d6   :  { %1730 = vmatprep.mubr.bf16.mxu1 %v1232_v18 }
 0x2d7   :  { %1731 = vmatmul.mubr.bf16.gmra.mrb[72].mxu1 %v1233_v17 }
 0x2dc   :  { %v1704_v19 = vpop.f32.mrb[76].mxu0 }
 0x2dd   :  { %v1206_v20 = vadd.f32 %v1704_v19, %v1496_v40  ;;  %v1197_v21 = vpop.f32.mrb[77].mxu0 }
 0x2de   :  { %v1198_v22 = vadd.f32 %v1496_v40, %v1197_v21  ;;  %v1705_v23 = vpop.f32.mrb[78].mxu0 }
 0x2df   :  { %v1209_v24 = vadd.f32 %v1705_v23, %v1496_v40  ;;  %v1200_v25 = vpop.f32.mrb[79].mxu0  ;;  %v1226_v27 = vmax.f32 %v1206_v20, 0.0 }
 0x2e0   :  { %v1201_v26 = vadd.f32 %v1496_v40, %v1200_v25  ;;  %v1224_v29 = vmax.f32 %v1198_v22, 0.0 }
 0x2e1   :  { %v1227_v28 = vmax.f32 %v1209_v24, 0.0 }
 0x2e2   :  { %v1225_v30 = vmax.f32 %v1201_v26, 0.0 }
 0x2e3   :  { %v1235_v31 = vpack.c.bf16 %v1227_v28, %v1226_v27 }
 0x2e4   :  { %v1234_v32 = vpack.c.bf16 %v1225_v30, %v1224_v29 }
 0x2e6   :  { %1734 = vmatprep.mubr.bf16.mxu1 %v1234_v32 }
 0x2e7   :  { %1735 = vmatmul.mubr.bf16.gmra.mrb[76].mxu1 %v1235_v31 }
 0x38a   :  { %v1724_v34 = vpop.f32.mrb[64].mxu1 }
 0x38b   :  { %v1350_v35 = vadd.f32 %v1724_v34, %v1505_v33  ;;  %v1341_v36 = vpop.f32.mrb[65].mxu1 }
 0x38c   :  { %v1342_v37 = vadd.f32 %v1505_v33, %v1341_v36  ;;  %v1725_v38 = vpop.f32.mrb[66].mxu1 }
 0x38d   :  { %1406 = vst [vmem:[%s2308_s9 + $0x10] sm:$0xff] %v1350_v35  ;;  %v1353_v39 = vadd.f32 %v1725_v38, %v1505_v33  ;;  %v1344_v40 = vpop.f32.mrb[67].mxu1 }
 0x38e   :  { %1404 = vst [vmem:[%s2308_s9] sm:$0xff] %v1342_v37  ;;  %v1345_v41 = vadd.f32 %v1505_v33, %v1344_v40 }
 0x38f   :  { %1407 = vst [vmem:[%s2308_s9 + $0x18] sm:$0xff] %v1353_v39 }
 0x390   :  { %1405 = vst [vmem:[%s2308_s9 + $0x8] sm:$0xff] %v1345_v41 }
 0x39a   :  { %v1728_v42 = vpop.f32.mrb[68].mxu1 }
 0x39b   :  { %v1366_v43 = vadd.f32 %v1728_v42, %v1505_v33  ;;  %v1357_v44 = vpop.f32.mrb[69].mxu1 }
 0x39c   :  { %v1358_v45 = vadd.f32 %v1505_v33, %v1357_v44  ;;  %v1729_v46 = vpop.f32.mrb[70].mxu1 }
 0x39d   :  { %1410 = vst [vmem:[%s2308_s9 + $0x30] sm:$0xff] %v1366_v43  ;;  %v1369_v47 = vadd.f32 %v1729_v46, %v1505_v33  ;;  %v1360_v48 = vpop.f32.mrb[71].mxu1 }
 0x39e   :  { %1408 = vst [vmem:[%s2308_s9 + $0x20] sm:$0xff] %v1358_v45  ;;  %v1361_v1 = vadd.f32 %v1505_v33, %v1360_v48 }
 0x39f   :  { %1411 = vst [vmem:[%s2308_s9 + $0x38] sm:$0xff] %v1369_v47 }
 0x3a0   :  { %1409 = vst [vmem:[%s2308_s9 + $0x28] sm:$0xff] %v1361_v1 }
 0x3aa   :  { %v1732_v49 = vpop.f32.mrb[72].mxu1 }
 0x3ab   :  { %v1382_v2 = vadd.f32 %v1732_v49, %v1505_v33  ;;  %v1373_v3 = vpop.f32.mrb[73].mxu1 }
 0x3ac   :  { %v1374_v4 = vadd.f32 %v1505_v33, %v1373_v3  ;;  %v1733_v50 = vpop.f32.mrb[74].mxu1 }
 0x3ad   :  { %1414 = vst [vmem:[%s2308_s9 + $0x50] sm:$0xff] %v1382_v2  ;;  %v1385_v51 = vadd.f32 %v1733_v50, %v1505_v33  ;;  %v1376_v52 = vpop.f32.mrb[75].mxu1 }
 0x3ae   :  { %1412 = vst [vmem:[%s2308_s9 + $0x40] sm:$0xff] %v1374_v4  ;;  %v1377_v53 = vadd.f32 %v1505_v33, %v1376_v52 }
 0x3af   :  { %1415 = vst [vmem:[%s2308_s9 + $0x58] sm:$0xff] %v1385_v51 }
 0x3b0   :  { %1413 = vst [vmem:[%s2308_s9 + $0x48] sm:$0xff] %v1377_v53 }
 0x3ba   :  { %v1736_v54 = vpop.f32.mrb[76].mxu1 }
 0x3bb   :  { %v1398_v55 = vadd.f32 %v1736_v54, %v1505_v33  ;;  %v1389_v56 = vpop.f32.mrb[77].mxu1 }
 0x3bc   :  { %v1390_v58 = vadd.f32 %v1505_v33, %v1389_v56  ;;  %v1737_v59 = vpop.f32.mrb[78].mxu1 }
 0x3bd   :  { %1418 = vst [vmem:[%s2308_s9 + $0x70] sm:$0xff] %v1398_v55  ;;  %v1401_v60 = vadd.f32 %v1737_v59, %v1505_v33  ;;  %v1392_v61 = vpop.f32.mrb[79].mxu1 }
 0x3be   :  { %1416 = vst [vmem:[%s2308_s9 + $0x60] sm:$0xff] %v1390_v58  ;;  %v1393_v62 = vadd.f32 %v1505_v33, %v1392_v61 }
 0x3bf   :  { %1419 = vst [vmem:[%s2308_s9 + $0x78] sm:$0xff] %v1401_v60 }
 0x3c0   :  { %1417 = vst [vmem:[%s2308_s9 + $0x68] sm:$0xff] %v1393_v62 }

</bundles_post_ra>
